<compile_context>
chip_gen: v7x
topology: tpu7x:2x2x1
jax: 0.10.0
libtpu: 0.0.40
codegen_flags: <defaults>
</compile_context>

<pallas_src>
import jax
import jax.numpy as jnp
from jax.experimental import pallas as pl
from jax.experimental.pallas import tpu as pltpu


def _round_up(x, m):
    return ((x + m - 1) // m) * m


def _sigmoid_f32(z):
    # EUP exp + approximate reciprocal (keeps the epilogue off the VALU slots).
    return pl.reciprocal(1.0 + jnp.exp(-z), approx=True)


# ---------------------------------------------------------------------------
# Kernels
# ---------------------------------------------------------------------------
def _cf_fullk_kernel(x_ref, w_ref, b_ref, o_ref):
    # x tile: (tm, K); W tile in PyTorch (out, in) layout: (tn, K).
    # Contract the last dim of both -> (tm, tn) on the MXU, f32 accumulation.
    # TODO(synk): verify in the bundle dump that this transposed-RHS contraction
    # emits no XLU transposes; if it does, pre-transpose W once at init.
    z = jax.lax.dot_general(
        x_ref[...], w_ref[...],
        dimension_numbers=(((1,), (1,)), ((), ())),
        preferred_element_type=jnp.float32,
    ) + b_ref[...]
    o_ref[...] = _sigmoid_f32(z).astype(o_ref.dtype)


def _cf_kloop_f32_kernel(x_ref, w_ref, b_ref, o_ref):
    # Tiled-K fallback, f32 output: accumulate directly into the resident
    # output block (no scratch accumulator).
    k = pl.program_id(2)

    @pl.when(k == 0)
    def _init():
        o_ref[...] = jnp.zeros_like(o_ref)

    o_ref[...] += jax.lax.dot_general(
        x_ref[...], w_ref[...],
        dimension_numbers=(((1,), (1,)), ((), ())),
        preferred_element_type=jnp.float32,
    )

    @pl.when(k == pl.num_programs(2) - 1)
    def _epilogue():
        o_ref[...] = _sigmoid_f32(o_ref[...] + b_ref[...])


def _cf_kloop_acc_kernel(x_ref, w_ref, b_ref, o_ref, acc_ref):
    # Tiled-K fallback for non-f32 outputs: f32 scratch accumulator.
    k = pl.program_id(2)

    @pl.when(k == 0)
    def _init():
        acc_ref[...] = jnp.zeros_like(acc_ref)

    acc_ref[...] += jax.lax.dot_general(
        x_ref[...], w_ref[...],
        dimension_numbers=(((1,), (1,)), ((), ())),
        preferred_element_type=jnp.float32,
    )

    @pl.when(k == pl.num_programs(2) - 1)
    def _epilogue():
        o_ref[...] = _sigmoid_f32(acc_ref[...] + b_ref[...]).astype(o_ref.dtype)


# ---------------------------------------------------------------------------
# Tile selection
# ---------------------------------------------------------------------------
def _choose_tiles(B, D, x_item, w_item, out_item, budget):
    Dp = _round_up(D, 128)

    # M tile: shrink to the batch for small B; prefer 256-row tiles for big B
    # (v6e/v7x 2x256x256 MXU); never pad M more than necessary.
    tm = _round_up(max(B, 1), 8)
    if max(x_item, out_item) == 2:        # bf16 native (16, 128) tile
        tm = _round_up(tm, 16)
    if tm > 256:
        tm = 256 if _round_up(B, 256) == _round_up(B, 128) else 128
    Bp = _round_up(B, tm)

    # Candidate N/K tiles: 128-multiples that divide Dp (no extra wrapper pad
    # of W beyond the 128 alignment), capped at 1024.
    divs = [t for t in range(128, Dp + 1, 128) if Dp % t == 0]
    divs_capped = [t for t in divs if t <= 1024] or [128]

    def ws(tn, tk, needs_acc):
        return (2 * tm * tk * x_item            # double-buffered x tiles
                + 2 * tn * tk * w_item          # double-buffered W tiles
                + 2 * tm * tn * out_item        # double-buffered out tiles
                + 2 * tn * 4                    # bias tile
                + (tm * tn * 4 if needs_acc else 0))

    # 1) Prefer full-K contraction: no reduction loop, no accumulator state.
    tk = Dp
    tn_fit = [t for t in divs_capped if ws(t, tk, False) <= budget]
    if tn_fit:
        tn = max(tn_fit)
        # Megacore / v7x dual-TC: keep >=2 parallel blocks when it costs no
        # extra HBM traffic (x/out blocks don't re-stream across j).
        if Bp // tm == 1 and Dp // tn == 1:
            multi = [t for t in tn_fit if Dp // t >= 2 and t >= 256]
            if multi:
                tn = max(multi)
        return tm, tn, tk, Bp, Dp

    # 2) Fallback: tile K as well (accumulate across k).
    needs_acc = out_item != 4
    for tk in sorted(divs, reverse=True):
        tn_fit = [t for t in divs_capped if ws(t, tk, needs_acc) <= budget]
        if tn_fit:
            return tm, max(tn_fit), tk, Bp, Dp
    raise ValueError("no tile configuration fits the given VMEM budget")


# ---------------------------------------------------------------------------
# Wrapper
# ---------------------------------------------------------------------------
def cf_likelihood(x, weight, bias, *, vmem_budget_bytes=40 * 1024 * 1024):
    """y = sigmoid(x @ W^T + b).

    x: (B, D); weight: (D, D) in PyTorch (out, in) layout; bias: (D,).
    Inputs may be f32 or bf16 (accumulation / bias / sigmoid always f32).
    """
    B, D = x.shape
    assert weight.shape == (D, D) and bias.shape == (D,)
    out_dtype = x.dtype
    x_item = x.dtype.itemsize
    w_item = weight.dtype.itemsize
    out_item = jnp.dtype(out_dtype).itemsize

    tm, tn, tk, Bp, Dp = _choose_tiles(B, D, x_item, w_item, out_item,
                                       vmem_budget_bytes)

    # Padding only when shapes are not already aligned. In production the
    # weight/bias should be stored pre-padded once at init (a per-call pad adds
    # an extra HBM pass over W).
    x_p = x if (Bp, Dp) == (B, D) else jnp.pad(x, ((0, Bp - B), (0, Dp - D)))
    w_p = weight if Dp == D else jnp.pad(weight, ((0, Dp - D), (0, Dp - D)))
    b_p = (bias if Dp == D else jnp.pad(bias, (0, Dp - D)))
    b_p = b_p.astype(jnp.float32).reshape(1, Dp)

    if tk == Dp:
        # No reduction loop: one matmul + bias + sigmoid per (i, j) block.
        grid = (Bp // tm, Dp // tn)
        out_p = pl.pallas_call(
            _cf_fullk_kernel,
            out_shape=jax.ShapeDtypeStruct((Bp, Dp), out_dtype),
            grid=grid,
            in_specs=[
                pl.BlockSpec((tm, tk), lambda i, j: (i, 0)),   # x
                pl.BlockSpec((tn, tk), lambda i, j: (j, 0)),   # W (out, in)
                pl.BlockSpec((1, tn), lambda i, j: (0, j)),    # bias
            ],
            out_specs=pl.BlockSpec((tm, tn), lambda i, j: (i, j)),
            compiler_params=pltpu.CompilerParams(
                dimension_semantics=("parallel", "parallel"),
                vmem_limit_bytes=48 * 1024 * 1024,
            ),
        )(x_p, w_p, b_p)
    else:
        # Tiled-K fallback (only for very large D vs. the VMEM budget).
        grid = (Bp // tm, Dp // tn, Dp // tk)
        if out_dtype == jnp.float32:
            kernel, scratch = _cf_kloop_f32_kernel, []
        else:
            kernel, scratch = _cf_kloop_acc_kernel, [pltpu.VMEM((tm, tn),
                                                                jnp.float32)]
        out_p = pl.pallas_call(
            kernel,
            out_shape=jax.ShapeDtypeStruct((Bp, Dp), out_dtype),
            grid=grid,
            in_specs=[
                pl.BlockSpec((tm, tk), lambda i, j, k: (i, k)),
                pl.BlockSpec((tn, tk), lambda i, j, k: (j, k)),
                pl.BlockSpec((1, tn), lambda i, j, k: (0, j)),
            ],
            out_specs=pl.BlockSpec((tm, tn), lambda i, j, k: (i, j)),
            scratch_shapes=scratch,
            compiler_params=pltpu.CompilerParams(
                dimension_semantics=("parallel", "parallel", "arbitrary"),
                vmem_limit_bytes=48 * 1024 * 1024,
            ),
        )(x_p, w_p, b_p)

    if (Bp, Dp) != (B, D):
        out_p = out_p[:B, :D]
    return out_p


# ---------------------------------------------------------------------------
if __name__ == "__main__":
    key = jax.random.PRNGKey(0)
    kx, kw, kb, kx2, kw2, kb2 = jax.random.split(key, 6)

    def ref_fn(x, w, b):
        return jax.nn.sigmoid(
            jnp.dot(x, w.T, precision=jax.lax.Precision.HIGHEST) + b)

    # --- small shape matching the module's nn.Linear(dim, dim) ---
    batch, dim = 8, 32
    x = jax.random.normal(kx, (batch, dim), dtype=jnp.float32)
    bound = 1.0 / (dim ** 0.5)
    w = jax.random.uniform(kw, (dim, dim), jnp.float32, -bound, bound)
    b = jax.random.uniform(kb, (dim,), jnp.float32, -bound, bound)

    out = jax.block_until_ready(cf_likelihood(x, w, b))
    assert out.shape == (batch, dim)
    assert jnp.allclose(out, ref_fn(x, w, b), atol=2e-3, rtol=2e-3)

    # --- larger shape: full-K contraction, multi-j-block parallel grid ---
    batch2, dim2 = 16, 768
    x2 = jax.random.normal(kx2, (batch2, dim2), dtype=jnp.float32)
    bound2 = 1.0 / (dim2 ** 0.5)
    w2 = jax.random.uniform(kw2, (dim2, dim2), jnp.float32, -bound2, bound2)
    b2 = jax.random.uniform(kb2, (dim2,), jnp.float32, -bound2, bound2)
    ref2 = ref_fn(x2, w2, b2)

    out2 = jax.block_until_ready(cf_likelihood(x2, w2, b2))
    assert out2.shape == (batch2, dim2)
    assert jnp.allclose(out2, ref2, atol=5e-3, rtol=5e-3)

    # --- force the tiled-K fallback (f32 output accumulates into o_ref) ---
    out3 = jax.block_until_ready(
        cf_likelihood(x2, w2, b2, vmem_budget_bytes=512 * 1024))
    assert jnp.allclose(out3, ref2, atol=5e-3, rtol=5e-3)

    # --- persistently-bf16 weights/activations: tiled-K with f32 scratch acc ---
    out4 = jax.block_until_ready(
        cf_likelihood(x2.astype(jnp.bfloat16), w2.astype(jnp.bfloat16), b2,
                      vmem_budget_bytes=256 * 1024))
    assert out4.dtype == jnp.bfloat16
    assert jnp.allclose(out4.astype(jnp.float32), ref2, atol=2e-2, rtol=2e-2)

    print("KERNEL_OK")
</pallas_src>

<mosaic_0001>
module attributes {stable_mosaic.version = 11 : i64} {
  func.func @_cf_fullk_kernel(%arg0: i32, %arg1: i32, %arg2: memref<8x128xf32, #tpu.memory_space<vmem>>, %arg3: memref<128x128xf32, #tpu.memory_space<vmem>>, %arg4: memref<1x128xf32, #tpu.memory_space<vmem>>, %arg5: memref<8x128xf32, #tpu.memory_space<vmem>>) attributes {dimension_semantics = [#tpu.dimension_semantics<parallel>, #tpu.dimension_semantics<parallel>], iteration_bounds = array<i64: 1, 1>, scalar_prefetch = 0 : i64, scratch_operands = 0 : i64, tpu.core_type = #tpu.core_type<tc>, window_params = [{transform_indices = @transform_0, window_bounds = array<i64: 8, 128>}, {transform_indices = @transform_1, window_bounds = array<i64: 128, 128>}, {transform_indices = @transform_2, window_bounds = array<i64: 1, 128>}, {transform_indices = @transform_3, window_bounds = array<i64: 8, 128>}]} {
    %c0 = arith.constant 0 : index
    %c0_0 = arith.constant 0 : index
    %0 = vector.load %arg2[%c0, %c0_0] : memref<8x128xf32, #tpu.memory_space<vmem>>, vector<8x128xf32>
    %c0_1 = arith.constant 0 : index
    %c0_2 = arith.constant 0 : index
    %1 = vector.load %arg3[%c0_1, %c0_2] : memref<128x128xf32, #tpu.memory_space<vmem>>, vector<128x128xf32>
    %cst = arith.constant dense<0.000000e+00> : vector<8x128xf32>
    %2 = tpu.matmul %0, %1, %cst {dimension_numbers = #tpu.dot_dimension_numbers<[1], [1], [0], [0], [0, 0, 1, 0], [], []>} : vector<8x128xf32>, vector<128x128xf32>, vector<8x128xf32> -> vector<8x128xf32>
    %c0_3 = arith.constant 0 : index
    %c0_4 = arith.constant 0 : index
    %3 = vector.load %arg4[%c0_3, %c0_4] : memref<1x128xf32, #tpu.memory_space<vmem>>, vector<1x128xf32>
    %4 = vector.broadcast %3 : vector<1x128xf32> to vector<8x128xf32>
    %5 = arith.addf %2, %4 : vector<8x128xf32>
    %cst_5 = arith.constant 0.000000e+00 : f32
    %6 = vector.broadcast %cst_5 : f32 to vector<8x128xf32>
    %7 = arith.subf %6, %5 : vector<8x128xf32>
    %8 = math.exp %7 : vector<8x128xf32>
    %cst_6 = arith.constant 1.000000e+00 : f32
    %9 = vector.broadcast %cst_6 : f32 to vector<8x128xf32>
    %10 = arith.addf %9, %8 : vector<8x128xf32>
    %11 = tpu.reciprocal %10 {approx = true} : vector<8x128xf32> -> vector<8x128xf32>
    %c0_7 = arith.constant 0 : index
    %c0_8 = arith.constant 0 : index
    %12 = vector.load %arg5[%c0_7, %c0_8] : memref<8x128xf32, #tpu.memory_space<vmem>>, vector<8x128xf32>
    tpu.vector_store %arg5[%c0_7, %c0_8], %11 {strides = array<i32>} : memref<8x128xf32, #tpu.memory_space<vmem>>, vector<8x128xf32>,
    return
  }
  func.func @transform_0(%arg0: i32, %arg1: i32) -> (i32, i32) {
    %c0_i32 = arith.constant 0 : i32
    %c0_i32_0 = arith.constant 0 : i32
    return %arg0, %c0_i32 : i32, i32
  }
  func.func @transform_1(%arg0: i32, %arg1: i32) -> (i32, i32) {
    %c0_i32 = arith.constant 0 : i32
    %c0_i32_0 = arith.constant 0 : i32
    return %arg1, %c0_i32 : i32, i32
  }
  func.func @transform_2(%arg0: i32, %arg1: i32) -> (i32, i32) {
    %c0_i32 = arith.constant 0 : i32
    %c0_i32_0 = arith.constant 0 : i32
    return %c0_i32, %arg1 : i32, i32
  }
  func.func @transform_3(%arg0: i32, %arg1: i32) -> (i32, i32) {
    %c0_i32 = arith.constant 0 : i32
    return %arg0, %arg1 : i32, i32
  }
}

</mosaic_0001>

<bundles_post_ra>
// kernel: tpu_custom_call.1
= control target key start
LH: loop header
LB: loop body
LE: loop exit
PB: predicated region body
PF: predicated region fallthrough
CT: control target
= control target key end

     0   :  { %8 = vsyncpa [#allocation3], 0  ;;  %s392_s0 = inlined_call_operand.hbm [shape: f32[8,128], index: 0, kind: input, shape index: {}]   ;;  %s393_s1 = inlined_call_operand.hbm [shape: f32[128,128], index: 1, kind: input, shape index: {}]   ;;  %s394_s2 = inlined_call_operand.vmem [shape: f32[1,128], index: 2, kind: input, shape index: {}]   ;;  %s395_s3 = inlined_call_operand.hbm [shape: f32[8,128], index: 3, kind: output, shape index: {}]  }
   0x1   :  { %9 = vsyncpa [#allocation6], 0 }
   0x2   :  { %10 = vsyncpa [#allocation4], 0  ;;  %s318_s12 = smov [#allocation2]   ;;  %s319_s14 = smov [#allocation5]  }
   0x3   :  { %s17_s13 = sshll.u32 %s318_s12, 4  ;;  %s26_s15 = sshll.u32 %s319_s14, 4  ;;  %s18_s13 = int_to_ptr.vmem [resolvable:$true] %s17_s13  ;;  %s346_s15 = int_to_ptr.vmem [resolvable:$true] %s26_s15 }
   0x4   :  { %s246_s18 = scalar_lea.hbm %s392_s0, 128 }
   0x5   :  { %p247_p0 = scmp.ne.s32.totalorder %s392_s0, %s246_s18  ;;  %p250_p1 = scmp.lt.u32.totalorder %s246_s18, %s392_s0 }
   0x7   :  { %p252_p2 = pnand %p250_p1, %p247_p0 }
   0x9   :  { %255 = shalt.err (!%p252_p2)
}
   0xa   :  { %s256_s23 = scalar_lea.vmem %s18_s13, 128  ;;  %p261_p4 = scmp.lt.s32.totalorder %s18_s13, %s18_s13 }
   0xb   :  { %p257_p3 = scmp.ne.s32.totalorder %s18_s13, %s256_s23  ;;  %p262_p5 = scmp.lt.s32.totalorder %s256_s23, %s256_s23 }
   0xd   :  { %p263_p6 = por %p262_p5, %p261_p4 }
   0xf   :  { %p264_p7 = pnand %p263_p6, %p257_p3 }
  0x11   :  { %267 = shalt.err (!%p264_p7)
}
  0x12   :  { %20 = dma.hbm_to_vmem [thread:$0]  %s392_s0, 128, %s18_s13, [#allocation3]  }
  0x13   :  { %s268_s28 = scalar_lea.hbm %s393_s1, 2048 }
  0x14   :  { %p269_p8 = scmp.ne.s32.totalorder %s393_s1, %s268_s28  ;;  %p272_p9 = scmp.lt.u32.totalorder %s268_s28, %s393_s1 }
  0x16   :  { %p274_p10 = pnand %p272_p9, %p269_p8 }
  0x18   :  { %277 = shalt.err (!%p274_p10)
}
  0x19   :  { %s278_s6 = scalar_lea.vmem %s346_s15, 2048  ;;  %p283_p12 = scmp.lt.s32.totalorder %s346_s15, %s346_s15 }
  0x1a   :  { %p279_p11 = scmp.ne.s32.totalorder %s346_s15, %s278_s6  ;;  %p284_p13 = scmp.lt.s32.totalorder %s278_s6, %s278_s6 }
  0x1c   :  { %p285_p0 = por %p284_p13, %p283_p12 }
  0x1e   :  { %p286_p1 = pnand %p285_p0, %p279_p11 }
  0x20   :  { %289 = shalt.err (!%p286_p1)
}
  0x21   :  { %s320_s0 = smov 128   ;;  %s321_s7 = smov 8  }
  0x22   :  { %32 = dma.hbm_to_vmem [thread:$0]  %s393_s1, 2048, %s346_s15, [#allocation6], %s320_s0, %s320_s0, %s321_s7  }
  0x23   :  { %312 = dma.done.wait [#allocation3], 128  }
  0x24   :  { %313 = vsyncadd [#allocation3], 4294967168 }
  0x25   :  { %314 = dma.done.wait [#allocation6], 2048  }
  0x26   :  { %315 = vsyncadd [#allocation6], 4294965248  ;;  %v322_v0 = vmov 0.0|0.0   ;;  %vm323_vm0 = vmmov 0   ;;  %v324_v1 = vmov 0.0   ;;  %v42_v2 = vld [vmem:[#allocation5] sm:$0xff] }
  0x27   :  { %210 = vmatprep.subr.bf16.mxu0 %v322_v0  ;;  %207 = vmatprep.mubr.msk.f32.mxu0 %vm323_vm0, %v324_v1  ;;  %v43_v3 = vld [vmem:[#allocation5 + $0x8] sm:$0xff]  ;;  %v44_v5 = vld [vmem:[#allocation5 + $0x10] sm:$0xff]  ;;  %v45_v6 = vld [vmem:[#allocation5 + $0x18] sm:$0xff]  ;;  %s325_s11 = smov [#allocation7]  }
  0x28   :  { %v211_v4 = vpack.c.bf16 %v43_v3, %v42_v2  ;;  %v214_v7 = vpack.c.bf16 %v45_v6, %v44_v5  ;;  %v46_v8 = vld [vmem:[#allocation5 + $0x20] sm:$0xff]  ;;  %v47_v9 = vld [vmem:[#allocation5 + $0x28] sm:$0xff]  ;;  %v48_v11 = vld [vmem:[#allocation5 + $0x30] sm:$0xff]  ;;  %s147_s12 = sshll.u32 %s325_s11, 4  ;;  %s148_s12 = int_to_ptr.vmem [resolvable:$true] %s147_s12 }
  0x29   :  { %v217_v10 = vpack.c.bf16 %v47_v9, %v46_v8  ;;  %v49_v12 = vld [vmem:[#allocation5 + $0x38] sm:$0xff]  ;;  %v50_v14 = vld [vmem:[#allocation5 + $0x40] sm:$0xff]  ;;  %v51_v15 = vld [vmem:[#allocation5 + $0x48] sm:$0xff]  ;;  %s290_s13 = scalar_lea.vmem %s148_s12, 128  ;;  %p295_p3 = scmp.lt.s32.totalorder %s148_s12, %s148_s12 }
  0x2a   :  { %212 = vmatpush3.bf16.xpose.msra.mxu0 %v211_v4  ;;  %v220_v13 = vpack.c.bf16 %v49_v12, %v48_v11  ;;  %v223_v16 = vpack.c.bf16 %v51_v15, %v50_v14  ;;  %v52_v17 = vld [vmem:[#allocation5 + $0x50] sm:$0xff]  ;;  %v53_v18 = vld [vmem:[#allocation5 + $0x58] sm:$0xff]  ;;  %v54_v20 = vld [vmem:[#allocation5 + $0x60] sm:$0xff]  ;;  %p291_p2 = scmp.ne.s32.totalorder %s148_s12, %s290_s13  ;;  %p296_p4 = scmp.lt.s32.totalorder %s290_s13, %s290_s13 }
  0x2b   :  { %213 = vmatprep.subr.bf16.mxu0 %v322_v0  ;;  %v226_v19 = vpack.c.bf16 %v53_v18, %v52_v17  ;;  %v55_v21 = vld [vmem:[#allocation5 + $0x68] sm:$0xff]  ;;  %v56_v23 = vld [vmem:[#allocation5 + $0x70] sm:$0xff]  ;;  %v57_v24 = vld [vmem:[#allocation5 + $0x78] sm:$0xff] }
  0x2c   :  { %v229_v22 = vpack.c.bf16 %v55_v21, %v54_v20  ;;  %v232_v25 = vpack.c.bf16 %v57_v24, %v56_v23  ;;  %v41_v26 = vld [vmem:[#allocation2] sm:$0xff]  ;;  %p297_p5 = por %p296_p4, %p295_p3 }
  0x2d   :  { %v157_v27 = vld [vmem:[%s394_s2] ss:$0 sm:$0xff] }
  0x2e   :  { %p298_p6 = pnand %p297_p5, %p291_p2 }
  0x32   :  { %215 = vmatpush3.bf16.xpose.msra.mxu0 %v214_v7 }
  0x33   :  { %216 = vmatprep.subr.bf16.mxu0 %v322_v0 }
  0x3a   :  { %218 = vmatpush3.bf16.xpose.msra.mxu0 %v217_v10 }
  0x3b   :  { %219 = vmatprep.subr.bf16.mxu0 %v322_v0 }
  0x42   :  { %221 = vmatpush3.bf16.xpose.msra.mxu0 %v220_v13 }
  0x43   :  { %222 = vmatprep.subr.bf16.mxu0 %v322_v0 }
  0x4a   :  { %224 = vmatpush3.bf16.xpose.msra.mxu0 %v223_v16 }
  0x4b   :  { %225 = vmatprep.subr.bf16.mxu0 %v322_v0 }
  0x52   :  { %227 = vmatpush3.bf16.xpose.msra.mxu0 %v226_v19 }
  0x53   :  { %228 = vmatprep.subr.bf16.mxu0 %v322_v0 }
  0x5a   :  { %230 = vmatpush3.bf16.xpose.msra.mxu0 %v229_v22 }
  0x5b   :  { %231 = vmatprep.subr.bf16.mxu0 %v322_v0 }
  0x62   :  { %233 = vmatpush3.bf16.xpose.msra.mxu0 %v232_v25 }
  0x69   :  { %208 = vmatmul.mubr.f32.vlgmr.msra.gmra.mrb[0].mxu0 %v41_v26 }
 0x13c   :  { %v131_v28 = vpop.f32.mrb[0].mxu0 }
 0x13d   :  { %v132_v29 = vadd.f32 %v157_v27, %v131_v28  ;;  %v209_v30 = vpop.f32.mrb[1].mxu0 }
 0x13f   :  { %v135_v31 = vsub.f32 0.0, %v132_v29 }
 0x141   :  { %v136_v32 = vmul.f32 1.442695, %v135_v31 }
 0x143   :  { %242 = vpow2.f32 %v136_v32 }
 0x14d   :  { %v243_v33 = vpop.eup %242 }
 0x14e   :  { %v138_v34 = vadd.f32 1.0, %v243_v33 }
 0x150   :  { %244 = vrcp.f32 %v138_v34 }
 0x15a   :  { %v245_v35 = vpop.eup %244 }
 0x15b   :  { %140 = vst [vmem:[#allocation7] sm:$0xff] %v245_v35 }
 0x15c   :  { %301 = shalt.err (!%p298_p6)
}
 0x15d   :  { %s302_s15 = scalar_lea.hbm %s395_s3, 128 }
 0x15e   :  { %p303_p7 = scmp.ne.s32.totalorder %s395_s3, %s302_s15  ;;  %p306_p8 = scmp.lt.u32.totalorder %s302_s15, %s395_s3 }
 0x160   :  { %p308_p9 = pnand %p306_p8, %p303_p7 }
 0x162   :  { %311 = shalt.err (!%p308_p9)
}
 0x163   :  { %150 = dma.vmem_to_hbm [thread:$0]  %s148_s12, 128, %s395_s3, [#allocation4]  }
 0x164   :  { %316 = dma.done.wait [#allocation4], 128  }
 0x165   :  { %317 = vsyncadd [#allocation4], 4294967168 }
 0x166   :  { %154 = vsyncpa [#allocation3], 1 }
 0x167   :  { %155 = vsyncpa [#allocation6], 1 }
 0x168   :  { %156 = vsyncpa [#allocation4], 1 }

</bundles_post_ra>
